<compile_context>
chip_gen: v5e
topology: v5e:2x2
jax: 0.10.0
libtpu: 0.0.40
codegen_flags: <defaults>
</compile_context>

<pallas_src>
import functools

import jax
import jax.numpy as jnp
from jax.experimental import pallas as pl
from jax.experimental.pallas import tpu as pltpu


def _make_dense_kernel(x_ref, w_ref, b_ref, o_ref, *, H, W, KH, KW, pad):
    """Processes `bb` batch images per grid step.

    x_ref: (bb, Cin, H*W)         input (channels-first, flattened spatial)
    w_ref: (Cout, KH*KW*Cin)      conv weights, tap-major / in-channel-minor
    b_ref: (Cout, 1)              conv bias
    o_ref: (bb, Cin+Cout, H*W)    output = concat([x, relu(conv(x))], channels)
    """
    bb, Cin, HW = x_ref.shape

    # Flattened spatial coordinates (lane-wise iota) and per-tap validity masks
    # implementing the conv's implicit zero padding.  Built once per grid step
    # and shared by all bb images (JAX does not CSE broadcast_in_dim, so this
    # must stay hoisted out of the per-image loop).
    pos = jax.lax.broadcasted_iota(jnp.int32, (1, HW), 1)      # p = i*W + j
    if W & (W - 1) == 0:
        col = pos & (W - 1)                                    # j = p mod W (pow2 W)
    else:
        col = pos % W    # TODO(synk): multiply-high reciprocal for non-pow2 W

    tap_meta = []  # (flat shift, validity mask or None) for each (ki, kj)
    for ki in range(KH):
        for kj in range(KW):
            di = ki - pad
            dj = kj - pad
            off = di * W + dj
            conds = []
            if di < 0:
                conds.append(pos >= (-di) * W)                 # i + di >= 0
            if di > 0:
                conds.append(pos < (H - di) * W)               # i + di <= H-1
            if dj < 0:
                conds.append(col >= -dj)                       # j + dj >= 0
            if dj > 0:
                conds.append(col < W - dj)                     # j + dj <= W-1
            valid = None
            for c in conds:
                valid = c if valid is None else (valid & c)
            tap_meta.append((off, valid))

    # Build the im2col operand fully in registers: (K, bb*HW).  Lane axis is
    # image-major flattened spatial; each image starts at a multiple of HW
    # lanes.  No VMEM scratch, no masked partial-sublane stores.
    x_imgs = []
    per_image = []
    for b in range(bb):
        x_b = x_ref[b]                                          # (Cin, HW)
        x_imgs.append(x_b)
        taps = []
        for off, valid in tap_meta:
            tap = x_b if off == 0 else pltpu.roll(x_b, shift=(-off) % HW, axis=1)
            if valid is not None:
                tap = jnp.where(valid, tap, 0.0)
            taps.append(tap)
        per_image.append(jnp.concatenate(taps, axis=0))         # (K, HW)
    patches = per_image[0] if bb == 1 else jnp.concatenate(per_image, axis=1)

    # Single fused MXU matmul over K = KH*KW*Cin and bb*HW lanes, f32 acc.
    conv = jnp.dot(w_ref[...], patches, preferred_element_type=jnp.float32)
    conv = jnp.maximum(conv + b_ref[...].astype(jnp.float32), 0.0)
    conv = conv.astype(o_ref.dtype)                             # (Cout, bb*HW)

    # torch.cat((x, relu(conv(x))), dim=1): one full-block store per image.
    for b in range(bb):
        o_ref[b] = jnp.concatenate(
            [x_imgs[b], conv[:, b * HW:(b + 1) * HW]], axis=0)


def make_dense_params(w_oihw, bias):
    """One-off weight relayout: OIHW -> (Cout, KH*KW*Cin), tap-major."""
    Cout, Cin, KH, KW = w_oihw.shape
    w2 = jnp.transpose(w_oihw, (0, 2, 3, 1)).reshape(Cout, KH * KW * Cin)
    b2 = bias.reshape(Cout, 1)
    return w2, b2


def _pick_batch_block(N):
    """Fattest per-step batch block that keeps a grid of length >= 2
    (so both TensorCores stay busy on v7x megacore)."""
    if N <= 1:
        return 1
    best = 1
    for d in range(1, N + 1):
        if N % d == 0 and N // d >= 2:
            best = d
    return best


def make_dense(x_nchw, w_oihw, bias, *, batch_block=None):
    """Pallas MakeDense.forward: NCHW in -> NCHW out (matches the PyTorch module)."""
    N, Cin, H, W = x_nchw.shape
    Cout, Cin_w, KH, KW = w_oihw.shape
    assert Cin_w == Cin
    # Like the PyTorch module, assumes an odd square kernel so padding=(k-1)//2
    # is "same" on both axes.
    pad = (KH - 1) // 2
    HW = H * W
    K = KH * KW * Cin

    bb = _pick_batch_block(N) if batch_block is None else batch_block
    assert N % bb == 0, "batch_block must divide N"

    # Cheap reshapes only (no activation transposes, no HBM pre-pad).
    x3 = x_nchw.reshape(N, Cin, HW)
    w2, b2 = make_dense_params(w_oihw, bias)

    kernel = functools.partial(_make_dense_kernel, H=H, W=W, KH=KH, KW=KW, pad=pad)

    elem = jnp.dtype(x_nchw.dtype).itemsize
    cost = pl.CostEstimate(
        flops=2 * N * Cout * K * HW + 2 * N * Cout * HW,
        transcendentals=0,
        bytes_accessed=(x3.size + w2.size + b2.size
                        + N * (Cin + Cout) * HW) * elem)

    out = pl.pallas_call(
        kernel,
        out_shape=jax.ShapeDtypeStruct((N, Cin + Cout, HW), x_nchw.dtype),
        grid=(N // bb,),
        in_specs=[
            pl.BlockSpec((bb, Cin, HW), lambda n: (n, 0, 0)),
            pl.BlockSpec((Cout, K), lambda n: (0, 0)),
            pl.BlockSpec((Cout, 1), lambda n: (0, 0)),
        ],
        out_specs=pl.BlockSpec((bb, Cin + Cout, HW), lambda n: (n, 0, 0)),
        compiler_params=pltpu.CompilerParams(
            dimension_semantics=("parallel",)),   # batch axis -> both TCs on v7x
        cost_estimate=cost,
    )(x3, w2, b2)

    return out.reshape(N, Cin + Cout, H, W)


def _reference(x_nchw, w_oihw, bias):
    """Pure-JAX reference (matches PyTorch F.conv2d + relu + cat)."""
    pad = (w_oihw.shape[2] - 1) // 2
    conv = jax.lax.conv_general_dilated(
        x_nchw, w_oihw, window_strides=(1, 1),
        padding=((pad, pad), (pad, pad)),
        dimension_numbers=("NCHW", "OIHW", "NCHW"))
    conv = jax.nn.relu(conv + bias[None, :, None, None])
    return jnp.concatenate([x_nchw, conv], axis=1)


if __name__ == "__main__":
    # Shapes implied by the module: MakeDense(in_channels=4, growth_rate=8, kernel_size=3)
    N, Cin, H, W = 2, 4, 16, 16
    growth_rate, ksize = 8, 3

    key = jax.random.PRNGKey(0)
    kx, kw, kb = jax.random.split(key, 3)
    x = jax.random.normal(kx, (N, Cin, H, W), dtype=jnp.float32)
    # Deterministic parameter init (Conv2d weight OIHW, bias O).
    fan_in = Cin * ksize * ksize
    bound = 1.0 / (fan_in ** 0.5)
    w = jax.random.uniform(kw, (growth_rate, Cin, ksize, ksize),
                           minval=-bound, maxval=bound, dtype=jnp.float32)
    b = jax.random.uniform(kb, (growth_rate,),
                           minval=-bound, maxval=bound, dtype=jnp.float32)

    out = make_dense(x, w, b)
    out = jax.block_until_ready(out)

    ref = _reference(x, w, b)
    assert out.shape == (N, Cin + growth_rate, H, W), out.shape
    assert jnp.allclose(out, ref, atol=1e-5, rtol=1e-5), "mismatch vs reference"

    print("KERNEL_OK")
</pallas_src>

<mosaic_0001>
module attributes {stable_mosaic.version = 11 : i64} {
  func.func @_make_dense_kernel(%arg0: i32, %arg1: memref<1x4x256xf32, #tpu.memory_space<vmem>>, %arg2: memref<8x36xf32, #tpu.memory_space<vmem>>, %arg3: memref<8x1xf32, #tpu.memory_space<vmem>>, %arg4: memref<1x12x256xf32, #tpu.memory_space<vmem>>) attributes {dimension_semantics = [#tpu.dimension_semantics<parallel>], iteration_bounds = array<i64: 2>, scalar_prefetch = 0 : i64, scratch_operands = 0 : i64, tpu.core_type = #tpu.core_type<tc>, window_params = [{transform_indices = @transform_0, window_bounds = array<i64: 1, 4, 256>}, {pipeline_mode = #tpu.pipeline_mode<synchronous>, transform_indices = @transform_1, window_bounds = array<i64: 8, 36>}, {pipeline_mode = #tpu.pipeline_mode<synchronous>, transform_indices = @transform_2, window_bounds = array<i64: 8, 1>}, {transform_indices = @transform_3, window_bounds = array<i64: 1, 12, 256>}]} {
    %0 = tpu.iota {dimensions = array<i32: 1>} : vector<1x256xi32>
    %c15_i32 = arith.constant 15 : i32
    %1 = vector.broadcast %c15_i32 : i32 to vector<1x256xi32>
    %2 = arith.andi %0, %1 : vector<1x256xi32>
    %c16_i32 = arith.constant 16 : i32
    %3 = vector.broadcast %c16_i32 : i32 to vector<1x256xi32>
    %4 = arith.cmpi sge, %0, %3 : vector<1x256xi32>
    %c1_i32 = arith.constant 1 : i32
    %5 = vector.broadcast %c1_i32 : i32 to vector<1x256xi32>
    %6 = arith.cmpi sge, %2, %5 : vector<1x256xi32>
    %7 = arith.andi %4, %6 : vector<1x256xi1>
    %c16_i32_0 = arith.constant 16 : i32
    %8 = vector.broadcast %c16_i32_0 : i32 to vector<1x256xi32>
    %9 = arith.cmpi sge, %0, %8 : vector<1x256xi32>
    %c16_i32_1 = arith.constant 16 : i32
    %10 = vector.broadcast %c16_i32_1 : i32 to vector<1x256xi32>
    %11 = arith.cmpi sge, %0, %10 : vector<1x256xi32>
    %c15_i32_2 = arith.constant 15 : i32
    %12 = vector.broadcast %c15_i32_2 : i32 to vector<1x256xi32>
    %13 = arith.cmpi slt, %2, %12 : vector<1x256xi32>
    %14 = arith.andi %11, %13 : vector<1x256xi1>
    %c1_i32_3 = arith.constant 1 : i32
    %15 = vector.broadcast %c1_i32_3 : i32 to vector<1x256xi32>
    %16 = arith.cmpi sge, %2, %15 : vector<1x256xi32>
    %c15_i32_4 = arith.constant 15 : i32
    %17 = vector.broadcast %c15_i32_4 : i32 to vector<1x256xi32>
    %18 = arith.cmpi slt, %2, %17 : vector<1x256xi32>
    %c240_i32 = arith.constant 240 : i32
    %19 = vector.broadcast %c240_i32 : i32 to vector<1x256xi32>
    %20 = arith.cmpi slt, %0, %19 : vector<1x256xi32>
    %c1_i32_5 = arith.constant 1 : i32
    %21 = vector.broadcast %c1_i32_5 : i32 to vector<1x256xi32>
    %22 = arith.cmpi sge, %2, %21 : vector<1x256xi32>
    %23 = arith.andi %20, %22 : vector<1x256xi1>
    %c240_i32_6 = arith.constant 240 : i32
    %24 = vector.broadcast %c240_i32_6 : i32 to vector<1x256xi32>
    %25 = arith.cmpi slt, %0, %24 : vector<1x256xi32>
    %c240_i32_7 = arith.constant 240 : i32
    %26 = vector.broadcast %c240_i32_7 : i32 to vector<1x256xi32>
    %27 = arith.cmpi slt, %0, %26 : vector<1x256xi32>
    %c15_i32_8 = arith.constant 15 : i32
    %28 = vector.broadcast %c15_i32_8 : i32 to vector<1x256xi32>
    %29 = arith.cmpi slt, %2, %28 : vector<1x256xi32>
    %30 = arith.andi %27, %29 : vector<1x256xi1>
    %c0 = arith.constant 0 : index
    %c0_9 = arith.constant 0 : index
    %c0_10 = arith.constant 0 : index
    %31 = vector.load %arg1[%c0, %c0_9, %c0_10] : memref<1x4x256xf32, #tpu.memory_space<vmem>>, vector<1x4x256xf32>
    %32 = vector.shape_cast %31 : vector<1x4x256xf32> to vector<4x256xf32>
    %c17_i32 = arith.constant 17 : i32
    %33 = tpu.dynamic_rotate %32 by %c17_i32 dim 1 : vector<4x256xf32>, i32 -> vector<4x256xf32>
    %cst = arith.constant 0.000000e+00 : f32
    %34 = vector.shape_cast %7 : vector<1x256xi1> to vector<1x256xi1>
    %35 = vector.broadcast %34 : vector<1x256xi1> to vector<4x256xi1>
    %36 = vector.broadcast %cst : f32 to vector<4x256xf32>
    %37 = arith.select %35, %33, %36 : vector<4x256xi1>, vector<4x256xf32>
    %c16_i32_11 = arith.constant 16 : i32
    %38 = tpu.dynamic_rotate %32 by %c16_i32_11 dim 1 : vector<4x256xf32>, i32 -> vector<4x256xf32>
    %cst_12 = arith.constant 0.000000e+00 : f32
    %39 = vector.shape_cast %9 : vector<1x256xi1> to vector<1x256xi1>
    %40 = vector.broadcast %39 : vector<1x256xi1> to vector<4x256xi1>
    %41 = vector.broadcast %cst_12 : f32 to vector<4x256xf32>
    %42 = arith.select %40, %38, %41 : vector<4x256xi1>, vector<4x256xf32>
    %c15_i32_13 = arith.constant 15 : i32
    %43 = tpu.dynamic_rotate %32 by %c15_i32_13 dim 1 : vector<4x256xf32>, i32 -> vector<4x256xf32>
    %cst_14 = arith.constant 0.000000e+00 : f32
    %44 = vector.shape_cast %14 : vector<1x256xi1> to vector<1x256xi1>
    %45 = vector.broadcast %44 : vector<1x256xi1> to vector<4x256xi1>
    %46 = vector.broadcast %cst_14 : f32 to vector<4x256xf32>
    %47 = arith.select %45, %43, %46 : vector<4x256xi1>, vector<4x256xf32>
    %c1_i32_15 = arith.constant 1 : i32
    %48 = tpu.dynamic_rotate %32 by %c1_i32_15 dim 1 : vector<4x256xf32>, i32 -> vector<4x256xf32>
    %cst_16 = arith.constant 0.000000e+00 : f32
    %49 = vector.shape_cast %16 : vector<1x256xi1> to vector<1x256xi1>
    %50 = vector.broadcast %49 : vector<1x256xi1> to vector<4x256xi1>
    %51 = vector.broadcast %cst_16 : f32 to vector<4x256xf32>
    %52 = arith.select %50, %48, %51 : vector<4x256xi1>, vector<4x256xf32>
    %c255_i32 = arith.constant 255 : i32
    %53 = tpu.dynamic_rotate %32 by %c255_i32 dim 1 : vector<4x256xf32>, i32 -> vector<4x256xf32>
    %cst_17 = arith.constant 0.000000e+00 : f32
    %54 = vector.shape_cast %18 : vector<1x256xi1> to vector<1x256xi1>
    %55 = vector.broadcast %54 : vector<1x256xi1> to vector<4x256xi1>
    %56 = vector.broadcast %cst_17 : f32 to vector<4x256xf32>
    %57 = arith.select %55, %53, %56 : vector<4x256xi1>, vector<4x256xf32>
    %c241_i32 = arith.constant 241 : i32
    %58 = tpu.dynamic_rotate %32 by %c241_i32 dim 1 : vector<4x256xf32>, i32 -> vector<4x256xf32>
    %cst_18 = arith.constant 0.000000e+00 : f32
    %59 = vector.shape_cast %23 : vector<1x256xi1> to vector<1x256xi1>
    %60 = vector.broadcast %59 : vector<1x256xi1> to vector<4x256xi1>
    %61 = vector.broadcast %cst_18 : f32 to vector<4x256xf32>
    %62 = arith.select %60, %58, %61 : vector<4x256xi1>, vector<4x256xf32>
    %c240_i32_19 = arith.constant 240 : i32
    %63 = tpu.dynamic_rotate %32 by %c240_i32_19 dim 1 : vector<4x256xf32>, i32 -> vector<4x256xf32>
    %cst_20 = arith.constant 0.000000e+00 : f32
    %64 = vector.shape_cast %25 : vector<1x256xi1> to vector<1x256xi1>
    %65 = vector.broadcast %64 : vector<1x256xi1> to vector<4x256xi1>
    %66 = vector.broadcast %cst_20 : f32 to vector<4x256xf32>
    %67 = arith.select %65, %63, %66 : vector<4x256xi1>, vector<4x256xf32>
    %c239_i32 = arith.constant 239 : i32
    %68 = tpu.dynamic_rotate %32 by %c239_i32 dim 1 : vector<4x256xf32>, i32 -> vector<4x256xf32>
    %cst_21 = arith.constant 0.000000e+00 : f32
    %69 = vector.shape_cast %30 : vector<1x256xi1> to vector<1x256xi1>
    %70 = vector.broadcast %69 : vector<1x256xi1> to vector<4x256xi1>
    %71 = vector.broadcast %cst_21 : f32 to vector<4x256xf32>
    %72 = arith.select %70, %68, %71 : vector<4x256xi1>, vector<4x256xf32>
    %73 = tpu.concatenate %37, %42, %47, %52, %32, %57, %62, %67, %72 in 0 : vector<4x256xf32>, vector<4x256xf32>, vector<4x256xf32>, vector<4x256xf32>, vector<4x256xf32>, vector<4x256xf32>, vector<4x256xf32>, vector<4x256xf32>, vector<4x256xf32> -> vector<36x256xf32>
    %c0_22 = arith.constant 0 : index
    %c0_23 = arith.constant 0 : index
    %74 = vector.load %arg2[%c0_22, %c0_23] : memref<8x36xf32, #tpu.memory_space<vmem>>, vector<8x36xf32>
    %cst_24 = arith.constant dense<0.000000e+00> : vector<8x256xf32>
    %75 = tpu.matmul %74, %73, %cst_24 {dimension_numbers = #tpu.dot_dimension_numbers<[1], [0], [0], [1], [0, 0, 1, 1], [], []>} : vector<8x36xf32>, vector<36x256xf32>, vector<8x256xf32> -> vector<8x256xf32>
    %c0_25 = arith.constant 0 : index
    %c0_26 = arith.constant 0 : index
    %76 = vector.load %arg3[%c0_25, %c0_26] : memref<8x1xf32, #tpu.memory_space<vmem>>, vector<8x1xf32>
    %77 = vector.broadcast %76 : vector<8x1xf32> to vector<8x256xf32>
    %78 = arith.addf %75, %77 : vector<8x256xf32>
    %cst_27 = arith.constant 0.000000e+00 : f32
    %79 = vector.broadcast %cst_27 : f32 to vector<8x256xf32>
    %80 = arith.maximumf %78, %79 : vector<8x256xf32>
    %81 = tpu.concatenate %32, %80 in 0 : vector<4x256xf32>, vector<8x256xf32> -> vector<12x256xf32>
    %c0_28 = arith.constant 0 : index
    %c0_29 = arith.constant 0 : index
    %c0_30 = arith.constant 0 : index
    %82 = vector.load %arg4[%c0_28, %c0_29, %c0_30] : memref<1x12x256xf32, #tpu.memory_space<vmem>>, vector<1x12x256xf32>
    %83 = vector.shape_cast %82 : vector<1x12x256xf32> to vector<12x256xf32>
    %84 = vector.shape_cast %81 : vector<12x256xf32> to vector<1x12x256xf32>
    tpu.vector_store %arg4[%c0_28, %c0_29, %c0_30], %84 {strides = array<i32>} : memref<1x12x256xf32, #tpu.memory_space<vmem>>, vector<1x12x256xf32>,
    return
  }
  func.func @transform_0(%arg0: i32) -> (i32, i32, i32) {
    %c0_i32 = arith.constant 0 : i32
    %c0_i32_0 = arith.constant 0 : i32
    %c0_i32_1 = arith.constant 0 : i32
    return %arg0, %c0_i32, %c0_i32_0 : i32, i32, i32
  }
  func.func @transform_1(%arg0: i32) -> (i32, i32) {
    %c0_i32 = arith.constant 0 : i32
    %c0_i32_0 = arith.constant 0 : i32
    %c0_i32_1 = arith.constant 0 : i32
    return %c0_i32, %c0_i32_0 : i32, i32
  }
  func.func @transform_2(%arg0: i32) -> (i32, i32) {
    %c0_i32 = arith.constant 0 : i32
    %c0_i32_0 = arith.constant 0 : i32
    %c0_i32_1 = arith.constant 0 : i32
    return %c0_i32, %c0_i32_0 : i32, i32
  }
  func.func @transform_3(%arg0: i32) -> (i32, i32, i32) {
    %c0_i32 = arith.constant 0 : i32
    %c0_i32_0 = arith.constant 0 : i32
    %c0_i32_1 = arith.constant 0 : i32
    return %arg0, %c0_i32, %c0_i32_0 : i32, i32, i32
  }
}

</mosaic_0001>

<bundles_post_ra>
// kernel: tpu_custom_call.1
= control target key start
LH: loop header
LB: loop body
LE: loop exit
PB: predicated region body
PF: predicated region fallthrough
CT: control target
= control target key end

     0   :  { %8 = vsyncpa [#allocation3], 0  ;;  %s956_s0 = inlined_call_operand.hbm [shape: f32[2,4,256], index: 0, kind: input, shape index: {}]   ;;  %s957_s1 = inlined_call_operand.vmem [shape: f32[8,36], index: 1, kind: input, shape index: {}]   ;;  %s958_s2 = inlined_call_operand.vmem [shape: f32[8,1], index: 2, kind: input, shape index: {}]   ;;  %s959_s3 = inlined_call_operand.vmem [shape: f32[2,12,256], index: 3, kind: output, shape index: {}]  }
   0x1   :  { %10 = vsyncpa [#allocation3 + $0x1], 0  ;;  %s736_s12 = smov 0   ;;  %s738_s13 = smov 0  }
   0x2   :  { %s740_s14 = smov 0   ;;  %s742_s15 = smov 0  }
   0x3 LB: > { %s755_s16 = sadd.s32 4294967295, %s705_s15   ;;  %s758_s17 = sadd.s32 1, %s705_s15   ;;  %s705_s15 = sphi %s742_s15, %s982_s15   ;;  %s701_s14 = sphi %s740_s14, %s981_s14   ;;  %s697_s13 = sphi %s738_s13, %s980_s13   ;;  %s693_s12 = sphi %s736_s12, %s979_s12  }
   0x4   : > { %s20_s18 = ssub.s32 %s705_s15, %s758_s17  ;;  %s23_s19 = sadd.s32 1, %s701_s14 }
   0x5   : > { %p21_p0 = scmp.eq.s32.totalorder %s20_s18, 0  ;;  %p30_p1 = scmp.ne.s32.totalorder %s701_s14, %s697_s13 }
   0x6   : > { %p31_p2 = scmp.eq.s32.totalorder %s705_s15, 0  ;;  %p36_p3 = scmp.ne.s32.totalorder %s697_s13, %s693_s12 }
   0x7   : > { %s768_s20 = scalar_select %p21_p0, %s701_s14, %s23_s19  }
   0x8   : > { %p770_p4 = por %p31_p2, %p30_p1  ;;  %p37_p5 = scmp.eq.s32.totalorder %s755_s16, 0 }
   0x9   : > { %p563_p6 = scmp.lt.s32.totalorder %s705_s15, 2  ;;  %s134_s23 = sand.u32 1, %s701_s14  }
   0xa   : > { %p776_p7 = por %p37_p5, %p36_p3  ;;  %s542_s24 = sshll.u32 %s134_s23, 3 }
   0xb   : > { %s555_s25 = sshll.u32 %s705_s15, 3  ;;  %s138_s29 = scalar_lea.vmem [#allocation2], %s542_s24 }
   0xc   : > { %s143_s28 = scalar_lea.hbm %s956_s0, %s555_s25  ;;  %s147_s30 = sshll.u32 %s138_s29, 4  ;;  %s148_s30 = int_to_ptr.vmem [resolvable:$true] %s147_s30 }
   0xd   : > { %s145_s4 = sshll.u32 %s143_s28, 4  ;;  %p787_p8 = pnand %p563_p6, %p770_p4  ;;  %s146_s4 = int_to_ptr.hbm [resolvable:$true] %s145_s4 }
   0xe   : > { %p545_p9 = scmp.ge.s32.totalorder %s705_s15, 1  ;;  %p152_p10 = scmp.lt.s32.totalorder %s705_s15, 3 }
   0xf   : > { %s135_s6 = scalar_lea.sflag [#allocation3], %s134_s23  ;;  %s641_s7 = sshra.s32 %s146_s4, 4  ;;  %s642_s7 = int_to_ptr.hbm [resolvable:$true] %s641_s7 }
  0x10   : > { %s643_s8 = scalar_lea.hbm %s642_s7, 8  ;;  %p645_p12 = pneg %p787_p8 }
  0x11   : > { %p644_p11 = scmp.ne.s32.totalorder %s642_s7, %s643_s8  ;;  %s648_s11 = scalar_lea.hbm %s956_s0, 16 }
  0x12   : > { %p649_p1 = scmp.lt.s32.totalorder %s642_s7, %s956_s0  ;;  %p650_p2 = scmp.lt.s32.totalorder %s648_s11, %s643_s8 }
  0x13   : > { %p646_p13 = pnand %p645_p12, %p644_p11 }
  0x14   : > { %p651_p3 = por %p650_p2, %p649_p1 }
  0x15   : > { %p647_p0 = pneg %p646_p13 }
  0x17   : > { %p652_p4 = pnand %p651_p3, %p647_p0 }
  0x19   : > { %655 = shalt.err (!%p652_p4)
}
  0x1a   : > { %562 = dma.hbm_to_vmem [thread:$0]  (!%p787_p8), %s146_s4, 128, %s148_s30, %s135_s6  }
  0x1b   : > { %p153_p5 = pnand %p545_p9, %p152_p10 }
  0x1c   : > { %s158_s19 = sand.u32 (!%p153_p5), 1, %s697_s13  }
  0x1d   : > { %156 = sbr.rel (%p153_p5) target bundleno = 368 (0x170), region = 32  ;;  %s546_s21 = sshll.u32 (!%p153_p5), %s158_s19, 3 }
  0x1e   : > { %s159_s23 = scalar_lea.sflag (!%p153_p5), [#allocation3], %s158_s19  ;;  %s162_s24 = scalar_lea.vmem (!%p153_p5), [#allocation2], %s546_s21 }
  0x22   : > { %688 = dma.done.wait (%p776_p7), %s159_s23, 128  }
  0x23   : > { %690 = vsyncadd (%p776_p7), %s159_s23, 4294967168  ;;  %v212_v0 = vld [vmem:[%s162_s24] sm:$0xff]  ;;  %s707_s15 = smov 127   ;;  %s708_s22 = smov 1   ;;  %v191_v27 = vlaneseq  ;;  %v397_v29 = vld [vmem:[%s958_s2] sm:$0xff]  ;;  %v715_v30 = vmov 0  }
  0x24   : > { %214 = vst [vmem:[#allocation1] ss:$2 sm:$0xff] %v212_v0  ;;  %s709_s25 = smov 113   ;;  %s710_s26 = smov 112   ;;  %640 = vset.pattern.permute.xlu0 %v715_v30  ;;  %vm387_vm11 = vcmask 1043456   ;;  %v396_v45 = vld [vmem:[%s957_s1] sm:$0xff] }
  0x25   : > { %s711_s27 = smov 17   ;;  %s712_s28 = smov 111   ;;  %v816_v28 = vand.u32 127, %v191_v27 }
  0x26   : > { %s713_s29 = smov 15   ;;  %s714_s30 = smov 16  }
  0x27   : > { %v193_v31 = vadd.s32 128, %v816_v28  ;;  %v194_v34 = vand.u32 15, %v816_v28  ;;  %vm331_vm0 = vcmp.lt.s32.totalorder %v816_v28, 112  ;;  %vm295_vm1 = vcmp.lt.s32.totalorder %v816_v28, 127  ;;  %p186_p6 = scmp.lt.s32.totalorder %s755_s16, 1 }
  0x28   : > { %vm313_vm3 = vcmp.lt.s32.totalorder %v816_v28, 113  ;;  %vm277_vm8 = vcmp.lt.s32.totalorder %v816_v28, 1  ;;  %vm349_vm9 = vcmp.lt.s32.totalorder %v816_v28, 111  ;;  %vm196_vm13 = vcmp.ge.s32.totalorder %v816_v28, 16 }
  0x29   : > { %v195_v35 = vand.u32 15, %v193_v31  ;;  %vm207_vm2 = vcmp.lt.s32.totalorder %v193_v31, 240  ;;  %vm826_vm4 = vcmp.lt.s32.totalorder %v194_v34, 15  ;;  %vm840_vm7 = vcmp.ge.s32.totalorder %v194_v34, 1  ;;  %s984_s16 = smov (!%p186_p6, %s755_s16), 1 }
  0x2a   : > { %vm223_vm14 = vcmp.lt.s32.totalorder %v816_v28, 17  ;;  %vm259_vm15 = vcmp.lt.s32.totalorder %v816_v28, 15  ;;  %s556_s8 = sshll.u32 %s984_s16, 5 }
  0x2b   : > { %v215_v1 = vld.sshfl [vmem:[#allocation1] sm:$0xff pattern:$0x75316420]  ;;  %v216_v2 = vld.sshfl [vmem:[#allocation1 + $0x8] sm:$0xff pattern:$0x75316420]  ;;  %s190_s11 = scalar_lea.vmem %s959_s3, %s556_s8 }
  0x2c   : > { %232 = vst [vmem:[#allocation1] ss:$2 sm:$0xff] %v212_v0  ;;  %v635_v18 = vpack.i.bf16 %v216_v2, %v215_v1  ;;  %vm830_vm5 = vcmp.ge.s32.totalorder %v195_v35, 1  ;;  %vm836_vm6 = vcmp.lt.s32.totalorder %v195_v35, 15 }
  0x2d   : > { %vm854_vm10 = vmand %vm207_vm2, %vm830_vm5 }
  0x2e   : > { %vm865_vm12 = vmand %vm207_vm2, %vm836_vm6 }
  0x33   : > { %v233_v3 = vld.sshfl [vmem:[#allocation1] sm:$0xff pattern:$0x75316420]  ;;  %v234_v4 = vld.sshfl [vmem:[#allocation1 + $0x8] sm:$0xff pattern:$0x75316420] }
  0x34   : > { %250 = vst [vmem:[#allocation1] ss:$2 sm:$0xff] %v212_v0  ;;  %v625_v23 = vpack.i.bf16 %v234_v4, %v233_v3 }
  0x3b   : > { %v251_v5 = vld.sshfl [vmem:[#allocation1] sm:$0xff pattern:$0x75316420]  ;;  %v252_v6 = vld.sshfl [vmem:[#allocation1 + $0x8] sm:$0xff pattern:$0x75316420] }
  0x3c   : > { %268 = vst [vmem:[#allocation1] ss:$2 sm:$0xff] %v212_v0  ;;  %v630_v22 = vpack.i.bf16 %v252_v6, %v251_v5 }
  0x43   : > { %v269_v7 = vld.sshfl [vmem:[#allocation1] sm:$0xff pattern:$0x75316420]  ;;  %v270_v8 = vld.sshfl [vmem:[#allocation1 + $0x8] sm:$0xff pattern:$0x75316420] }
  0x44   : > { %286 = vst [vmem:[#allocation1] ss:$2 sm:$0xff] %v212_v0  ;;  %v605_v12 = vpack.i.bf16 %v270_v8, %v269_v7 }
  0x46   : > { %606 = vrot.lane.b32.xlu2 %v605_v12, %s708_s22 }
  0x4b   : > { %v287_v9 = vld.sshfl [vmem:[#allocation1] sm:$0xff pattern:$0x75316420]  ;;  %v288_v10 = vld.sshfl [vmem:[#allocation1 + $0x8] sm:$0xff pattern:$0x75316420] }
  0x4c   : > { %v610_v11 = vpack.i.bf16 %v288_v10, %v287_v9  ;;  %304 = vst [vmem:[#allocation1] ss:$2 sm:$0xff] %v212_v0 }
  0x4e   : > { %611 = vrot.lane.b32.xlu1 %v610_v11, %s707_s15 }
  0x53   : > { %v305_v13 = vld.sshfl [vmem:[#allocation1] sm:$0xff pattern:$0x75316420]  ;;  %v306_v14 = vld.sshfl [vmem:[#allocation1 + $0x8] sm:$0xff pattern:$0x75316420] }
  0x54   : > { %322 = vst [vmem:[#allocation1] ss:$2 sm:$0xff] %v212_v0  ;;  %v615_v15 = vpack.i.bf16 %v306_v14, %v305_v13 }
  0x56   : > { %616 = vrot.lane.b32.xlu2 %v615_v15, %s709_s25 }
  0x5b   : > { %v323_v16 = vld.sshfl [vmem:[#allocation1] sm:$0xff pattern:$0x75316420]  ;;  %v324_v17 = vld.sshfl [vmem:[#allocation1 + $0x8] sm:$0xff pattern:$0x75316420] }
  0x5c   : > { %v620_v19 = vpack.i.bf16 %v324_v17, %v323_v16  ;;  %340 = vst [vmem:[#allocation1] ss:$2 sm:$0xff] %v212_v0 }
  0x5e   : > { %621 = vrot.lane.b32.xlu0 %v620_v19, %s710_s26  ;;  %636 = vrot.lane.b32.xlu2 %v635_v18, %s711_s27 }
  0x63   : > { %v342_v20 = vld.sshfl [vmem:[#allocation1 + $0x8] sm:$0xff pattern:$0x75316420]  ;;  %v341_v21 = vld.sshfl [vmem:[#allocation1] sm:$0xff pattern:$0x75316420] }
  0x64   : > { %347 = vrot.lane.b32.xlu1 %v342_v20, %s712_s28  ;;  %370 = vst [vmem:[#allocation1] ss:$2 sm:$0xff] %v212_v0 }
  0x66   : > { %345 = vrot.lane.b32.xlu0 %v341_v21, %s712_s28 }
  0x6b   : > { %v812_v24 = vld.sshfl [vmem:[#allocation1] sm:$0xff pattern:$0x75316420]  ;;  %v814_v25 = vld.sshfl [vmem:[#allocation1 + $0x8] sm:$0xff pattern:$0x75316420] }
  0x6c   : > { %631 = vrot.lane.b32.xlu1 %v630_v22, %s713_s29  ;;  %455 = vst [vmem:[#allocation1] ss:$2 sm:$0xff] %v212_v0 }
  0x6e   : > { %626 = vrot.lane.b32.xlu0 %v625_v23, %s714_s30 }
  0x76   : > { %400 = vperm.xlu0 %640, %v397_v29  }
  0xa0   : > { %v607_v26 = vpop.permute.xlu2 %606 }
  0xa1   : > { %v609_v43 = vunpack.i.h.bf16 %v607_v26  ;;  %v608_v44 = vunpack.i.l.bf16 %v607_v26 }
  0xa3   : > { %v279_v2 = vsel %vm277_vm8, %v609_v43, %v608_v44  ;;  %v278_v6 = vsel %vm277_vm8, %v608_v44, %v609_v43 }
  0xa4   : > { %v284_v15 = vsel %vm840_vm7, %v279_v2, 0.0  ;;  %v285_v16 = vsel %vm830_vm5, %v278_v6, 0.0 }
  0xa5   : > { %v366_v26 = vrot.slane %v284_v15, 4 }
  0xb0   : > { %v617_v33 = vpop.permute.xlu2 %616 }
  0xb1   : > { %v619_v39 = vunpack.i.h.bf16 %v617_v33  ;;  %v618_v42 = vunpack.i.l.bf16 %v617_v33 }
  0xb3   : > { %v314_v52 = vsel %vm313_vm3, %v618_v42, %v619_v39  ;;  %v315_v57 = vsel %vm313_vm3, %v619_v39, %v618_v42  ;;  %vm403_vm3 = vcmask 293888  }
  0xb4   : > { %v320_v62 = vsel %vm840_vm7, %v314_v52, 0.0  ;;  %v321_v5 = vsel %vm854_vm10, %v315_v57, 0.0 }
  0xb8   : > { %v637_v1 = vpop.permute.xlu2 %636 }
  0xb9   : > { %v639_v11 = vunpack.i.h.bf16 %v637_v1  ;;  %v638_v12 = vunpack.i.l.bf16 %v637_v1 }
  0xbb   : > { %v224_v23 = vsel %vm223_vm14, %v638_v12, %v639_v11  ;;  %v225_v27 = vsel %vm223_vm14, %v639_v11, %v638_v12 }
  0xc0   : > { %v612_v32 = vpop.permute.xlu1 %611 }
  0xc1   : > { %v614_v36 = vunpack.i.h.bf16 %v612_v32  ;;  %v613_v37 = vunpack.i.l.bf16 %v612_v32 }
  0xc3   : > { %v296_v48 = vsel %vm295_vm1, %v613_v37, %v614_v36  ;;  %v297_v51 = vsel %vm295_vm1, %v614_v36, %v613_v37  ;;  %vm241_vm1 = vcmp.lt.s32.totalorder %v816_v28, 16  ;;  %v231_v36 = vsel %vm830_vm5, %v224_v23, 0.0 }
  0xc4   : > { %v302_v58 = vsel %vm826_vm4, %v296_v48, 0.0  ;;  %v303_v60 = vsel %vm836_vm6, %v297_v51, 0.0 }
  0xc5   : > { %v377_v9 = vrot.slane %v302_v58, 4  ;;  %v378_v10 = vrot.slane %v303_v60, 4 }
  0xc7   : > { %v392_v18 = vsel %vm387_vm11, %v812_v24, %v377_v9  ;;  %v393_v19 = vsel %vm387_vm11, %v814_v25, %v378_v10  ;;  %v367_v25 = vrot.slane %v285_v16, 4 }
  0xd0   : > { %v622_v38 = vpop.permute.xlu0 %621 }
  0xd1   : > { %v624_v40 = vunpack.i.h.bf16 %v622_v38  ;;  %v623_v41 = vunpack.i.l.bf16 %v622_v38 }
  0xd3   : > { %v333_v47 = vsel %vm331_vm0, %v624_v40, %v623_v41  ;;  %v332_v53 = vsel %vm331_vm0, %v623_v41, %v624_v40  ;;  %vm902_vm0 = vmand %vm196_vm13, %vm826_vm4 }
  0xd4   : > { %v339_v54 = vsel %vm207_vm2, %v333_v47, 0.0  ;;  %v383_v63 = vrot.slane %v332_v53, 4  ;;  %vm915_vm2 = vmand %vm196_vm13, %vm840_vm7 }
  0xd5   : > { %v384_v0 = vrot.slane %v339_v54, 4  ;;  %v230_v42 = vsel %vm915_vm2, %v225_v27, 0.0  ;;  %v457_v54 = vld.sshfl [vmem:[#allocation1 + $0x8] sm:$0xff pattern:$0x75316420] }
  0xd6   : > { %v348_v55 = vpop.permute.xlu1 %347  ;;  %v394_v13 = vsel %vm387_vm11, %v320_v62, %v383_v63 }
  0xd7   : > { %v395_v14 = vsel %vm387_vm11, %v321_v5, %v384_v0 }
  0xd8   : > { %v346_v61 = vpop.permute.xlu0 %345 }
  0xd9   : > { %v350_v3 = vsel %vm349_vm9, %v346_v61, %v348_v55  ;;  %v351_v4 = vsel %vm349_vm9, %v348_v55, %v346_v61  ;;  %v456_v55 = vld.sshfl [vmem:[#allocation1] sm:$0xff pattern:$0x75316420] }
  0xda   : > { %v356_v7 = vsel %vm826_vm4, %v350_v3, 0.0  ;;  %v357_v8 = vsel %vm865_vm12, %v351_v4, 0.0 }
  0xdb   : > { %549 = vmatpush.msk.msra.mxu0 %vm387_vm11, %v356_v7  ;;  %551 = vmatpush.msk.msra.mxu1 %vm387_vm11, %v357_v8 }
  0xdd   : > { %425 = vmatpush.msra.mxu0 %v394_v13  ;;  %445 = vmatpush.msra.mxu1 %v395_v14 }
  0xde   : > { %v632_v17 = vpop.permute.xlu1 %631 }
  0xdf   : > { %v634_v20 = vunpack.i.h.bf16 %v632_v17  ;;  %v633_v21 = vunpack.i.l.bf16 %v632_v17  ;;  %426 = vmatpush.msra.mxu0 %v392_v18  ;;  %446 = vmatpush.msra.mxu1 %v393_v19 }
  0xe0   : > { %v627_v24 = vpop.permute.xlu0 %626 }
  0xe1   : > { %v629_v29 = vunpack.i.h.bf16 %v627_v24  ;;  %v628_v30 = vunpack.i.l.bf16 %v627_v24  ;;  %v261_v31 = vsel %vm259_vm15, %v634_v20, %v633_v21  ;;  %v260_v32 = vsel %vm259_vm15, %v633_v21, %v634_v20 }
  0xe2   : > { %v266_v34 = vsel %vm902_vm0, %v261_v31, 0.0  ;;  %v267_v35 = vsel %vm836_vm6, %v260_v32, 0.0 }
  0xe3   : > { %v390_v37 = vsel %vm387_vm11, %v266_v34, %v366_v26  ;;  %v391_v38 = vsel %vm387_vm11, %v267_v35, %v367_v25  ;;  %v242_v39 = vsel %vm241_vm1, %v628_v30, %v629_v29  ;;  %v243_v40 = vsel %vm241_vm1, %v629_v29, %v628_v30 }
  0xe4   : > { %427 = vmatpush.msra.mxu0 %v390_v37  ;;  %447 = vmatpush.msra.mxu1 %v391_v38  ;;  %v361_v41 = vrot.slane %v242_v39, 4  ;;  %v248_v43 = vsel %vm196_vm13, %v243_v40, 0.0 }
  0xe5   : > { %v360_v44 = vrot.slane %v248_v43, 4 }
  0xe6   : > { %v389_v46 = vsel %vm387_vm11, %v231_v36, %v361_v41 }
  0xe7   : > { %448 = vmatpush.msra.mxu1 %v389_v46  ;;  %v388_v47 = vsel %vm387_vm11, %v230_v42, %v360_v44 }
  0xe8   : > { %428 = vmatpush.msra.mxu0 %v388_v47  ;;  %552 = vmatmul.msk.f32.vlgmr.msra.gmra.mxu1 %vm403_vm3, %v396_v45  ;;  %v401_v48 = vpop.permute.xlu0 %400 }
  0xe9   : > { %550 = vmatmul.msk.f32.vlgmr.msra.gmra.mxu0 %vm403_vm3, %v396_v45 }
 0x165   : > { %v450_v49 = vpop.f32.mrf.mxu1 }
 0x166   : > { %v430_v28 = vpop.f32.mrf.mxu0  ;;  %v451_v50 = vadd.f32 %v450_v49, %v401_v48 }
 0x167   : > { %v431_v51 = vadd.f32 %v430_v28, %v401_v48 }
 0x168   : > { %v454_v52 = vmax.f32 %v451_v50, 0.0 }
 0x169   : > { %v453_v53 = vmax.f32 %v431_v51, 0.0 }
 0x16a   : > { %v463_v56 = vrot.slane %v454_v52, 4 }
 0x16b   : > { %v462_v57 = vrot.slane %v453_v53, 4 }
 0x16c   : > { %v467_v58 = vsel %vm387_vm11, %v457_v54, %v463_v56  ;;  %471 = vst [vmem:[%s190_s11 + $0x18] sm:$0xf] %v463_v56 }
 0x16d   : > { %v466_v59 = vsel %vm387_vm11, %v456_v55, %v462_v57  ;;  %470 = vst [vmem:[%s190_s11 + $0x10] sm:$0xf] %v462_v57 }
 0x16e   : > { %468 = vst [vmem:[%s190_s11] sm:$0xff] %v466_v59 }
 0x16f   : > { %469 = vst [vmem:[%s190_s11 + $0x8] sm:$0xff] %v467_v58 }
 0x170 PF: > { %p13_p7 = scmp.ge.s32.totalorder %s758_s17, 4   ;;  %s979_s12 = smov %s697_s13 }
 0x171   : > { %s980_s13 = smov %s701_s14  ;;  %s981_s14 = smov %s768_s20 }
 0x172   : > { %s982_s15 = smov %s758_s17  ;;  %15 = sbr.rel (!%p13_p7) target bundleno = 3 (0x3), region = 72 }
 0x177   :  { %493 = vsyncpa [#allocation3], 1 }
 0x178   :  { %495 = vsyncpa [#allocation3 + $0x1], 1 }

</bundles_post_ra>
